<compile_context>
chip_gen: v7x
topology: tpu7x:2x2x1
jax: 0.10.0
libtpu: 0.0.40
codegen_flags: <defaults>
</compile_context>

<pallas_src>
import functools

import numpy as np

import jax
import jax.numpy as jnp
from jax.experimental import pallas as pl
from jax.experimental.pallas import tpu as pltpu

NEG_SLOPE = 0.2
BN_EPS = 1e-5
HIDDEN = 256
HEADS_WC = 384            # hidden (256) + 1 validity column, lane-padded to 3*128
_HEADS_TF_CAP = 8192      # ~6 MiB bf16 weight tile per heads grid step


# ----------------------------------------------------------------------------
# Chip-aware sizing (v5e/v6e: 128 MiB VMEM, v7x: 64 MiB per TensorCore)
# ----------------------------------------------------------------------------
_VMEM_CAP = None


def _vmem_cap_bytes():
    global _VMEM_CAP
    if _VMEM_CAP is None:
        try:
            info = pltpu.get_tpu_info()
            _VMEM_CAP = int(getattr(info, "vmem_capacity_bytes", 64 * 2**20))
        except Exception:
            _VMEM_CAP = 64 * 2**20          # conservative: v7x per-core VMEM
    return _VMEM_CAP


def _vmem_limit_bytes():
    cap = _vmem_cap_bytes()
    return int(min(max(cap * 3 // 4, 32 * 2**20), 112 * 2**20))


def _x_tile_budget_bytes():
    # ~2-4 MiB bf16 patch tile per grid step (tiny tiles were overhead dominated).
    return (4 if _vmem_cap_bytes() >= 100 * 2**20 else 3) * 2**20


def _cparams(semantics):
    return pltpu.CompilerParams(dimension_semantics=semantics,
                                vmem_limit_bytes=_vmem_limit_bytes())


def _pick_m_tile(m, k, budget_bytes, cap=8192):
    """Row tile targeting ~budget bytes of bf16 patches, multiple of 8, <= cap."""
    tm = budget_bytes // (2 * k)
    tm = max(256, min(tm, cap))
    tm = max(8, (tm // 8) * 8)
    return m if tm >= m else tm


def _heads_f_tile(f, c):
    """F tile for the heads GEMM: multiple of the final channel count, <= cap."""
    cap = max(c, (_HEADS_TF_CAP // c) * c)
    return min(f, cap)


# ----------------------------------------------------------------------------
# Pallas kernels
# ----------------------------------------------------------------------------
def _conv_lrelu_kernel(x_ref, w_ref, b_ref, o_ref):
    """Layer without BN: y = LeakyReLU(x @ W + b); f32 accumulate, bf16 store."""
    y = jnp.dot(x_ref[...], w_ref[...], preferred_element_type=jnp.float32)
    y = y + b_ref[...]
    o_ref[...] = jnp.where(y >= 0, y, NEG_SLOPE * y).astype(o_ref.dtype)


def _conv_core(x, w_ref, b_ref, y_ref, stats_ref, *, rows, tm):
    """y = x @ W + b (pre-BN, bf16) + per-tile BN partials (sum, centered M2)."""
    y = jnp.dot(x, w_ref[...], preferred_element_type=jnp.float32) + b_ref[...]
    yb = y.astype(y_ref.dtype)
    y_ref[...] = yb
    # Stats on the bf16-rounded values (what the downstream prologue will see).
    yf = yb.astype(jnp.float32)
    row0 = pl.program_id(0) * tm
    valid = (jax.lax.broadcasted_iota(jnp.int32, (tm, 1), 0) + row0) < rows
    n = jnp.maximum(jnp.sum(valid.astype(jnp.float32)), 1.0)
    yv = jnp.where(valid, yf, 0.0)
    s = jnp.sum(yv, axis=0, keepdims=True)                     # (1, C)
    mu = s / n
    d = jnp.where(valid, yf - mu, 0.0)
    m2 = jnp.sum(d * d, axis=0, keepdims=True)                 # (1, C)
    stats_ref[...] = jnp.stack([s, m2], axis=1)                # (1, 2, C)


def _conv_bn_stats_kernel(x_ref, w_ref, b_ref, y_ref, stats_ref, *, rows, tm):
    _conv_core(x_ref[...], w_ref, b_ref, y_ref, stats_ref, rows=rows, tm=tm)


def _conv_prologue_bn_stats_kernel(sc_ref, sh_ref, x_ref, w_ref, b_ref,
                                   y_ref, stats_ref, *, rows, tm):
    """Previous layer's BN + LeakyReLU fused as a prologue on the patch tile."""
    x = x_ref[...].astype(jnp.float32) * sc_ref[...] + sh_ref[...]
    x = jnp.where(x >= 0, x, NEG_SLOPE * x).astype(jnp.bfloat16)
    _conv_core(x, w_ref, b_ref, y_ref, stats_ref, rows=rows, tm=tm)


def _heads_partial_kernel(x_ref, wc_ref, sc_ref, sh_ref, part_ref, acc_ref):
    """Partial heads GEMM over the F-tile reduction axis with an f32 accumulator.

    Prologue applies the last conv layer's BN + LeakyReLU to the flat tile.
    """
    j = pl.program_id(1)

    @pl.when(j == 0)
    def _():
        acc_ref[...] = jnp.zeros_like(acc_ref)

    x = x_ref[...].astype(jnp.float32) * sc_ref[...] + sh_ref[...]
    x = jnp.where(x >= 0, x, NEG_SLOPE * x).astype(jnp.bfloat16)
    acc_ref[...] += jnp.dot(x, wc_ref[...], preferred_element_type=jnp.float32)

    @pl.when(j == pl.num_programs(1) - 1)
    def _():
        part_ref[...] = acc_ref[...].reshape(part_ref.shape)


# ----------------------------------------------------------------------------
# Wrappers
# ----------------------------------------------------------------------------
def conv_layer_plain(patches, w, b, *, budget):
    M, K = patches.shape
    C = w.shape[1]
    tm = _pick_m_tile(M, K, budget)
    T = -(-M // tm)
    return pl.pallas_call(
        _conv_lrelu_kernel,
        out_shape=jax.ShapeDtypeStruct((M, C), jnp.bfloat16),
        grid=(T,),
        in_specs=[pl.BlockSpec((tm, K), lambda i: (i, 0)),
                  pl.BlockSpec((K, C), lambda i: (0, 0)),
                  pl.BlockSpec((1, C), lambda i: (0, 0))],
        out_specs=pl.BlockSpec((tm, C), lambda i: (i, 0)),
        compiler_params=_cparams(("parallel",)),
    )(patches, w, b)


def _bn_scale_shift(stats, m_rows, tm, gamma, beta):
    """Combine per-tile (sum, centered M2) partials into BN scale/shift (f32)."""
    T = stats.shape[0]
    counts = np.minimum(tm, m_rows - np.arange(T) * tm).astype(np.float32)  # static
    cnt = jnp.asarray(counts)[:, None]
    s = stats[:, 0, :]
    m2 = stats[:, 1, :]
    mean_t = s / cnt
    mean = jnp.sum(s, axis=0) / float(m_rows)
    m2_tot = jnp.sum(m2, axis=0) + jnp.sum(cnt * (mean_t - mean[None, :]) ** 2, axis=0)
    var = jnp.maximum(m2_tot / float(m_rows), 0.0)   # biased, PyTorch training-mode BN
    inv = jax.lax.rsqrt(var + BN_EPS)
    scale = gamma * inv
    shift = beta - mean * scale
    return scale.reshape(1, -1), shift.reshape(1, -1)


def conv_layer_bn(patches, w, b, gamma, beta, *, prologue, budget):
    """Conv layer followed by BatchNorm: emits pre-BN y (bf16) and BN scale/shift."""
    M, K = patches.shape
    C = w.shape[1]
    tm = _pick_m_tile(M, K, budget)
    T = -(-M // tm)

    x_spec = pl.BlockSpec((tm, K), lambda i: (i, 0))
    w_spec = pl.BlockSpec((K, C), lambda i: (0, 0))
    b_spec = pl.BlockSpec((1, C), lambda i: (0, 0))
    y_spec = pl.BlockSpec((tm, C), lambda i: (i, 0))
    st_spec = pl.BlockSpec((1, 2, C), lambda i: (i, 0, 0))

    if prologue is None:
        kern = functools.partial(_conv_bn_stats_kernel, rows=M, tm=tm)
        in_specs = [x_spec, w_spec, b_spec]
        args = (patches, w, b)
    else:
        scale4, shift4 = prologue
        kern = functools.partial(_conv_prologue_bn_stats_kernel, rows=M, tm=tm)
        v_spec = pl.BlockSpec((1, K), lambda i: (0, 0))
        in_specs = [v_spec, v_spec, x_spec, w_spec, b_spec]
        args = (scale4, shift4, patches, w, b)

    y, stats = pl.pallas_call(
        kern,
        out_shape=(jax.ShapeDtypeStruct((M, C), jnp.bfloat16),
                   jax.ShapeDtypeStruct((T, 2, C), jnp.float32)),
        grid=(T,),
        in_specs=in_specs,
        out_specs=(y_spec, st_spec),
        compiler_params=_cparams(("parallel",)),
    )(*args)

    scale, shift = _bn_scale_shift(stats, M, tm, gamma, beta)
    return y, scale, shift


def heads_partial(flat, wc, scale, shift, *, tf):
    """Fused [W1 | Wv] heads GEMM over F tiles; returns the (N, 384) accumulator."""
    N, F = flat.shape
    F_pad, WC = wc.shape
    C = scale.shape[1]
    if F_pad > F:                         # wc rows beyond F are zero -> no-op padding
        flat = jnp.pad(flat, ((0, 0), (0, F_pad - F)))
    n_f = F_pad // tf
    # Split the F reduction over a leading "parallel" axis so v7x's two
    # TensorCores each stream half of wc; harmless (serial) on v5e/v6e.
    P = 2 if (n_f % 2 == 0 and n_f >= 2) else 1
    jn = n_f // P
    reps = tf // C
    sc_t = jnp.tile(scale, (1, reps))     # last conv layer's BN folded into prologue
    sh_t = jnp.tile(shift, (1, reps))
    parts = pl.pallas_call(
        _heads_partial_kernel,
        out_shape=jax.ShapeDtypeStruct((P, N, WC), jnp.float32),
        grid=(P, jn),
        in_specs=[
            pl.BlockSpec((N, tf), lambda p, j: (0, p * jn + j)),
            pl.BlockSpec((tf, WC), lambda p, j: (p * jn + j, 0)),
            pl.BlockSpec((1, tf), lambda p, j: (0, 0)),
            pl.BlockSpec((1, tf), lambda p, j: (0, 0)),
        ],
        out_specs=pl.BlockSpec((1, N, WC), lambda p, j: (p, 0, 0)),
        scratch_shapes=[pltpu.VMEM((N, WC), jnp.float32)],
        compiler_params=_cparams(("parallel", "arbitrary")),
    )(flat, wc, sc_t, sh_t)
    return jnp.sum(parts, axis=0)


# ----------------------------------------------------------------------------
# Glue: im2col for Conv1d(kernel=4, stride=2, padding=1) via static strided slices
# ----------------------------------------------------------------------------
def im2col1d(x_nlc, kernel=4, stride=2, pad=1):
    """Returns (N*L_out, kernel*C) patches with column order k*C + c (no gather)."""
    # TODO(synk): form the 4 taps in-kernel from a halo'd input block (manual DMA)
    # to avoid the 2x patch inflation on the bandwidth-bound early layers.
    N, L, C = x_nlc.shape
    l_out = (L + 2 * pad - kernel) // stride + 1
    xp = jnp.pad(x_nlc, ((0, 0), (pad, pad), (0, 0)))
    taps = [xp[:, k::stride, :][:, :l_out, :] for k in range(kernel)]
    patches = jnp.concatenate(taps, axis=-1)
    return patches.reshape(N * l_out, kernel * C), l_out


# ----------------------------------------------------------------------------
# Parameter init (deterministic, synthetic weights in PyTorch layouts)
# ----------------------------------------------------------------------------
def init_params(key, input_size, condition_dim=8, output_channels=1):
    chans = [output_channels, 16, 32, 64, 128, 256, 512]
    K = 4
    keys = jax.random.split(key, 18)
    ki = 0
    convs = []
    for i in range(6):
        cin, cout = chans[i], chans[i + 1]
        w = jax.random.normal(keys[ki], (cout, cin, K), jnp.float32) / np.sqrt(cin * K)
        ki += 1
        b = 0.01 * jax.random.normal(keys[ki], (1, cout), jnp.float32)
        ki += 1
        # PyTorch Conv1d weight (C_out, C_in, K) -> matmul weight (K*C_in, C_out),
        # matching the patch column order k*C_in + c.
        wm = jnp.transpose(w, (2, 1, 0)).reshape(K * cin, cout).astype(jnp.bfloat16)
        use_bn = i > 0                    # BatchNorm on conv layers 2..6
        convs.append({
            "w": wm, "b": b, "bn": use_bn,
            "gamma": jnp.ones((cout,), jnp.float32) if use_bn else None,
            "beta": jnp.zeros((cout,), jnp.float32) if use_bn else None,
        })

    l_final = input_size // 64
    c_final = 512
    flat = c_final * l_final

    # Head weights in PyTorch layout: flatten index = c * L + l (x.view on NCL).
    wv = jax.random.normal(keys[ki], (flat, 1), jnp.float32) / np.sqrt(flat); ki += 1
    bv = 0.01 * jax.random.normal(keys[ki], (1, 1), jnp.float32); ki += 1
    w1 = jax.random.normal(keys[ki], (flat, HIDDEN), jnp.float32) / np.sqrt(flat); ki += 1
    b1 = 0.01 * jax.random.normal(keys[ki], (1, HIDDEN), jnp.float32); ki += 1
    w2 = jax.random.normal(keys[ki], (HIDDEN, condition_dim), jnp.float32) / np.sqrt(HIDDEN); ki += 1
    b2 = 0.01 * jax.random.normal(keys[ki], (1, condition_dim), jnp.float32); ki += 1

    # Permute head-weight rows from the (C, L) PyTorch-flatten order to the kernel's
    # (L, C) channels-last flatten order so flat = h.reshape(N, -1) is zero-copy.
    def to_lc_order(wmat):
        cols = wmat.shape[1]
        return wmat.reshape(c_final, l_final, cols).transpose(1, 0, 2).reshape(flat, cols)

    w1_lc = to_lc_order(w1)
    wv_lc = to_lc_order(wv)

    # Fused, lane-padded head weight [W1 | Wv | 0], rows zero-padded to a multiple
    # of the heads F tile (zero rows make the reduction padding a no-op).
    tf = _heads_f_tile(flat, c_final)
    f_pad = -(-flat // tf) * tf
    wc = jnp.zeros((f_pad, HEADS_WC), jnp.float32)
    wc = wc.at[:flat, :HIDDEN].set(w1_lc)
    wc = wc.at[:flat, HIDDEN].set(wv_lc[:, 0])
    wc = wc.astype(jnp.bfloat16)
    bc = jnp.zeros((1, HEADS_WC), jnp.float32)
    bc = bc.at[:, :HIDDEN].set(b1)
    bc = bc.at[:, HIDDEN].set(bv[:, 0])

    return {"convs": convs, "wc": wc, "bc": bc, "w2": w2, "b2": b2,
            "tf": tf, "hidden": HIDDEN, "cond_dim": condition_dim}


# ----------------------------------------------------------------------------
# Forward pass (matches AudioDiscriminator.forward)
# ----------------------------------------------------------------------------
def audio_discriminator_forward(x_ncl, params):
    N = x_ncl.shape[0]
    budget = _x_tile_budget_bytes()
    h = jnp.transpose(x_ncl, (0, 2, 1)).astype(jnp.bfloat16)    # (N, L, C) channels-last
    pending = None        # deferred (scale, shift) of the previous layer's BatchNorm
    for layer in params["convs"]:
        patches, l_out = im2col1d(h)                             # (N*L_out, 4*C_in) bf16
        prologue = None
        if pending is not None:
            # Previous layer's BN + LeakyReLU folded in as a per-column
            # (col k*C+c -> channel c) scale/shift prologue.
            prologue = (jnp.tile(pending[0], (1, 4)), jnp.tile(pending[1], (1, 4)))
        if layer["bn"]:
            y, scale, shift = conv_layer_bn(patches, layer["w"], layer["b"],
                                            layer["gamma"], layer["beta"],
                                            prologue=prologue, budget=budget)
            pending = (scale, shift)
        else:
            y = conv_layer_plain(patches, layer["w"], layer["b"], budget=budget)
            pending = None
        h = y.reshape(N, l_out, layer["w"].shape[1])

    # Zero-copy flatten in (L, C) order; head-weight rows were permuted to match.
    flat = h.reshape(N, -1)
    acc = heads_partial(flat, params["wc"], pending[0], pending[1], tf=params["tf"])

    # Tiny (N, 384) finalize in XLA: bias, split, LeakyReLU, 256->cond GEMM, sigmoids.
    z = acc + params["bc"]
    hid = params["hidden"]
    hmid = z[:, :hid]
    v_logit = z[:, hid]
    hmid = jnp.where(hmid >= 0, hmid, NEG_SLOPE * hmid)
    ctx = hmid @ params["w2"] + params["b2"]
    validity = jax.nn.sigmoid(v_logit)[:, None]
    context = jax.nn.sigmoid(ctx)
    return validity, context


if __name__ == "__main__":
    INPUT_SIZE = 256       # small stand-in for 88200; must be divisible by 64
    CONDITION_DIM = 8
    OUT_CHANNELS = 1
    BATCH = 2

    key = jax.random.PRNGKey(0)
    pkey, xkey = jax.random.split(key)
    params = init_params(pkey, INPUT_SIZE, CONDITION_DIM, OUT_CHANNELS)

    x = jax.random.normal(xkey, (BATCH, OUT_CHANNELS, INPUT_SIZE), jnp.float32)

    validity, context = audio_discriminator_forward(x, params)
    jax.block_until_ready((validity, context))

    assert validity.shape == (BATCH, 1), validity.shape
    assert context.shape == (BATCH, CONDITION_DIM), context.shape
    assert bool(jnp.all(jnp.isfinite(validity))) and bool(jnp.all(jnp.isfinite(context)))
    assert bool(jnp.all((validity >= 0) & (validity <= 1)))
    assert bool(jnp.all((context >= 0) & (context <= 1)))
    print("KERNEL_OK")
</pallas_src>

<mosaic_0001>
module attributes {stable_mosaic.version = 11 : i64} {
  func.func @_conv_lrelu_kernel(%arg0: i32, %arg1: memref<256x4xbf16, #tpu.memory_space<vmem>>, %arg2: memref<4x16xbf16, #tpu.memory_space<vmem>>, %arg3: memref<1x16xf32, #tpu.memory_space<vmem>>, %arg4: memref<256x16xbf16, #tpu.memory_space<vmem>>) attributes {dimension_semantics = [#tpu.dimension_semantics<parallel>], iteration_bounds = array<i64: 1>, scalar_prefetch = 0 : i64, scratch_operands = 0 : i64, tpu.core_type = #tpu.core_type<tc>, window_params = [{transform_indices = @transform_0, window_bounds = array<i64: 256, 4>}, {pipeline_mode = #tpu.pipeline_mode<synchronous>, transform_indices = @transform_1, window_bounds = array<i64: 4, 16>}, {pipeline_mode = #tpu.pipeline_mode<synchronous>, transform_indices = @transform_2, window_bounds = array<i64: 1, 16>}, {transform_indices = @transform_3, window_bounds = array<i64: 256, 16>}]} {
    %c0 = arith.constant 0 : index
    %c0_0 = arith.constant 0 : index
    %0 = vector.load %arg1[%c0, %c0_0] : memref<256x4xbf16, #tpu.memory_space<vmem>>, vector<256x4xbf16>
    %c0_1 = arith.constant 0 : index
    %c0_2 = arith.constant 0 : index
    %1 = vector.load %arg2[%c0_1, %c0_2] : memref<4x16xbf16, #tpu.memory_space<vmem>>, vector<4x16xbf16>
    %cst = arith.constant dense<0.000000e+00> : vector<256x16xf32>
    %2 = tpu.matmul %0, %1, %cst {dimension_numbers = #tpu.dot_dimension_numbers<[1], [0], [0], [1], [0, 0, 1, 1], [], []>} : vector<256x4xbf16>, vector<4x16xbf16>, vector<256x16xf32> -> vector<256x16xf32>
    %c0_3 = arith.constant 0 : index
    %c0_4 = arith.constant 0 : index
    %3 = vector.load %arg3[%c0_3, %c0_4] : memref<1x16xf32, #tpu.memory_space<vmem>>, vector<1x16xf32>
    %4 = vector.broadcast %3 : vector<1x16xf32> to vector<256x16xf32>
    %5 = arith.addf %2, %4 : vector<256x16xf32>
    %cst_5 = arith.constant 0.000000e+00 : f32
    %6 = vector.broadcast %cst_5 : f32 to vector<256x16xf32>
    %7 = arith.cmpf oge, %5, %6 : vector<256x16xf32>
    %cst_6 = arith.constant 2.000000e-01 : f32
    %8 = vector.broadcast %cst_6 : f32 to vector<256x16xf32>
    %9 = arith.mulf %8, %5 : vector<256x16xf32>
    %10 = arith.select %7, %5, %9 : vector<256x16xi1>, vector<256x16xf32>
    %11 = arith.truncf %10 : vector<256x16xf32> to vector<256x16xbf16>
    %c0_7 = arith.constant 0 : index
    %c0_8 = arith.constant 0 : index
    %12 = vector.load %arg4[%c0_7, %c0_8] : memref<256x16xbf16, #tpu.memory_space<vmem>>, vector<256x16xbf16>
    tpu.vector_store %arg4[%c0_7, %c0_8], %11 {strides = array<i32>} : memref<256x16xbf16, #tpu.memory_space<vmem>>, vector<256x16xbf16>,
    return
  }
  func.func @transform_0(%arg0: i32) -> (i32, i32) {
    %c0_i32 = arith.constant 0 : i32
    %c0_i32_0 = arith.constant 0 : i32
    return %arg0, %c0_i32 : i32, i32
  }
  func.func @transform_1(%arg0: i32) -> (i32, i32) {
    %c0_i32 = arith.constant 0 : i32
    %c0_i32_0 = arith.constant 0 : i32
    %c0_i32_1 = arith.constant 0 : i32
    return %c0_i32, %c0_i32_0 : i32, i32
  }
  func.func @transform_2(%arg0: i32) -> (i32, i32) {
    %c0_i32 = arith.constant 0 : i32
    %c0_i32_0 = arith.constant 0 : i32
    %c0_i32_1 = arith.constant 0 : i32
    return %c0_i32, %c0_i32_0 : i32, i32
  }
  func.func @transform_3(%arg0: i32) -> (i32, i32) {
    %c0_i32 = arith.constant 0 : i32
    %c0_i32_0 = arith.constant 0 : i32
    return %arg0, %c0_i32 : i32, i32
  }
}

</mosaic_0001>

<bundles_post_ra>
// kernel: tpu_custom_call.1
= control target key start
LH: loop header
LB: loop body
LE: loop exit
PB: predicated region body
PF: predicated region fallthrough
CT: control target
= control target key end

     0   :  { %vm184_vm0 = vcmask 1041408   ;;  %vm135_vm1 = vcmask 31744   ;;  %vm573_vm2 = vcmask 125952   ;;  %s1032_s1 = inlined_call_operand.vmem [shape: bf16[4,16], index: 1, kind: input, shape index: {}]   ;;  %s1033_s0 = inlined_call_operand.vmem [shape: bf16[256,4], index: 0, kind: input, shape index: {}]   ;;  %s1034_s2 = inlined_call_operand.vmem [shape: f32[1,16], index: 2, kind: input, shape index: {}]   ;;  %s1035_s3 = inlined_call_operand.vmem [shape: bf16[256,16], index: 3, kind: output, shape index: {}]  }
   0x1   :  { %v47_v0 = vld [vmem:[%s1032_s1] sm:$0x3]  ;;  %v764_v4 = vld [vmem:[%s1033_s0 + $0x8] sm:$0xff]   ;;  %v766_v6 = vld [vmem:[%s1033_s0 + $0x10] sm:$0xff]  }
   0x2   :  { %760 = vmatprep.subr.msk.bf16.mxu0 %vm184_vm0, %v47_v0  ;;  %761 = vmatprep.subr.msk.bf16.mxu1 %vm184_vm0, %v47_v0  ;;  %v186_v1 = vsel %vm184_vm0, %v47_v0, 0  ;;  %v762_v2 = vld [vmem:[%s1033_s0] sm:$0xff]   ;;  %v765_v5 = vld [vmem:[%s1033_s0 + $0x48] sm:$0xff]   ;;  %v767_v7 = vld [vmem:[%s1033_s0 + $0x50] sm:$0xff]  }
   0x3   :  { %725 = vmatpush3.bf16.msra.mxu0 %v186_v1  ;;  %759 = vmatpush3.bf16.msra.mxu1 %v186_v1  ;;  %v763_v3 = vld [vmem:[%s1033_s0 + $0x40] sm:$0xff]   ;;  %v768_v8 = vld [vmem:[%s1033_s0 + $0x18] sm:$0xff]   ;;  %v772_v12 = vld [vmem:[%s1033_s0 + $0x28] sm:$0xff]  }
   0x4   :  { %726 = vmatprep.mubr.msk.bf16.mxu0 %vm135_vm1, %v762_v2  ;;  %742 = vmatprep.mubr.msk.bf16.mxu1 %vm135_vm1, %v763_v3  ;;  %v769_v9 = vld [vmem:[%s1033_s0 + $0x58] sm:$0xff]   ;;  %v770_v10 = vld [vmem:[%s1033_s0 + $0x20] sm:$0xff]   ;;  %v773_v13 = vld [vmem:[%s1033_s0 + $0x68] sm:$0xff]  }
   0x5   :  { %v771_v11 = vld [vmem:[%s1033_s0 + $0x60] sm:$0xff]   ;;  %v774_v14 = vld [vmem:[%s1033_s0 + $0x30] sm:$0xff]   ;;  %v776_v16 = vld [vmem:[%s1033_s0 + $0x38] sm:$0xff]  }
   0x6   :  { %727 = vmatmul.mubr.msk.bf16.vlgmr.msra.gmra.mrb[0].mxu0 %vm135_vm1, %v764_v4  ;;  %743 = vmatmul.mubr.msk.bf16.vlgmr.msra.gmra.mrb[0].mxu1 %vm135_vm1, %v765_v5  ;;  %v775_v15 = vld [vmem:[%s1033_s0 + $0x70] sm:$0xff]   ;;  %v777_v17 = vld [vmem:[%s1033_s0 + $0x78] sm:$0xff]   ;;  %v868_v18 = vld [vmem:[%s1034_s2] ss:$0 sm:$0xff] }
   0x7   :  { %730 = vmatprep.mubr.msk.bf16.mxu0 %vm135_vm1, %v766_v6  ;;  %746 = vmatprep.mubr.msk.bf16.mxu1 %vm135_vm1, %v767_v7 }
   0xe   :  { %731 = vmatmul.mubr.msk.bf16.gmra.mrb[4].mxu0 %vm135_vm1, %v768_v8  ;;  %747 = vmatmul.mubr.msk.bf16.gmra.mrb[4].mxu1 %vm135_vm1, %v769_v9 }
   0xf   :  { %734 = vmatprep.mubr.msk.bf16.mxu0 %vm135_vm1, %v770_v10  ;;  %750 = vmatprep.mubr.msk.bf16.mxu1 %vm135_vm1, %v771_v11 }
  0x16   :  { %735 = vmatmul.mubr.msk.bf16.gmra.mrb[8].mxu0 %vm135_vm1, %v772_v12  ;;  %751 = vmatmul.mubr.msk.bf16.gmra.mrb[8].mxu1 %vm135_vm1, %v773_v13 }
  0x17   :  { %738 = vmatprep.mubr.msk.bf16.mxu0 %vm135_vm1, %v774_v14  ;;  %754 = vmatprep.mubr.msk.bf16.mxu1 %vm135_vm1, %v775_v15 }
  0x1e   :  { %739 = vmatmul.mubr.msk.bf16.gmra.mrb[12].mxu0 %vm135_vm1, %v776_v16  ;;  %755 = vmatmul.mubr.msk.bf16.gmra.mrb[12].mxu1 %vm135_vm1, %v777_v17 }
  0xd9   :  { %v728_v19 = vpop.f32.mrb[0].mxu0  ;;  %v744_v21 = vpop.f32.mrb[0].mxu1 }
  0xda   :  { %v231_v20 = vadd.f32 %v728_v19, %v868_v18  ;;  %v222_v22 = vpop.f32.mrb[1].mxu0  ;;  %v295_v23 = vadd.f32 %v744_v21, %v868_v18  ;;  %v286_v25 = vpop.f32.mrb[1].mxu1 }
  0xdb   :  { %v223_v24 = vadd.f32 %v868_v18, %v222_v22  ;;  %v729_v26 = vpop.f32.mrb[2].mxu0  ;;  %v287_v28 = vadd.f32 %v868_v18, %v286_v25  ;;  %v745_v30 = vpop.f32.mrb[2].mxu1 }
  0xdc   :  { %vm351_vm3 = vcmp.ge.f32.partialorder %v231_v20, 0.0  ;;  %v383_v27 = vmul.f32 0.2, %v231_v20  ;;  %v234_v29 = vadd.f32 %v729_v26, %v868_v18  ;;  %v225_v31 = vpop.f32.mrb[3].mxu0  ;;  %vm367_vm4 = vcmp.ge.f32.partialorder %v295_v23, 0.0  ;;  %v289_v36 = vpop.f32.mrb[3].mxu1 }
  0xdd   :  { %v399_v32 = vmul.f32 0.2, %v295_v23  ;;  %vm349_vm5 = vcmp.ge.f32.partialorder %v223_v24, 0.0  ;;  %v381_v33 = vmul.f32 0.2, %v223_v24  ;;  %vm365_vm6 = vcmp.ge.f32.partialorder %v287_v28, 0.0 }
  0xde   :  { %v415_v34 = vsel %vm351_vm3, %v231_v20, %v383_v27  ;;  %v397_v35 = vmul.f32 0.2, %v287_v28  ;;  %vm352_vm7 = vcmp.ge.f32.partialorder %v234_v29, 0.0  ;;  %v384_v40 = vmul.f32 0.2, %v234_v29 }
  0xdf   :  { %v677_v37 = vpack.c.bf16 %v415_v34, %v415_v34  ;;  %v431_v38 = vsel %vm367_vm4, %v295_v23, %v399_v32  ;;  %v413_v39 = vsel %vm349_vm5, %v223_v24, %v381_v33  ;;  %v298_v44 = vadd.f32 %v745_v30, %v868_v18 }
  0xe0   :  { %v693_v41 = vpack.c.bf16 %v431_v38, %v431_v38  ;;  %v675_v42 = vpack.c.bf16 %v413_v39, %v413_v39  ;;  %v429_v43 = vsel %vm365_vm6, %v287_v28, %v397_v35  ;;  %v416_v46 = vsel %vm352_vm7, %v234_v29, %v384_v40 }
  0xe1   :  { %576 = vst.msk [vmem:[%s1035_s3 + $0x8] sm:$0xf] %vm573_vm2, %v677_v37  ;;  %v691_v45 = vpack.c.bf16 %v429_v43, %v429_v43  ;;  %v226_v47 = vadd.f32 %v868_v18, %v225_v31  ;;  %v290_v48 = vadd.f32 %v868_v18, %v289_v36  ;;  %v732_v49 = vpop.f32.mrb[4].mxu0  ;;  %v678_v50 = vpack.c.bf16 %v416_v46, %v416_v46  ;;  %v748_v53 = vpop.f32.mrb[4].mxu1 }
  0xe2   :  { %592 = vst.msk [vmem:[%s1035_s3 + $0x48] sm:$0xf] %vm573_vm2, %v693_v41  ;;  %574 = vst.msk [vmem:[%s1035_s3] sm:$0xf] %vm573_vm2, %v675_v42  ;;  %vm368_vm8 = vcmp.ge.f32.partialorder %v298_v44, 0.0  ;;  %v247_v52 = vadd.f32 %v732_v49, %v868_v18  ;;  %v238_v54 = vpop.f32.mrb[5].mxu0  ;;  %v311_v59 = vadd.f32 %v748_v53, %v868_v18 }
  0xe3   :  { %v400_v51 = vmul.f32 0.2, %v298_v44  ;;  %590 = vst.msk [vmem:[%s1035_s3 + $0x40] sm:$0xf] %vm573_vm2, %v691_v45  ;;  %vm350_vm9 = vcmp.ge.f32.partialorder %v226_v47, 0.0  ;;  %vm366_vm10 = vcmp.ge.f32.partialorder %v290_v48, 0.0  ;;  %v239_v1 = vadd.f32 %v868_v18, %v238_v54 }
  0xe4   :  { %v382_v55 = vmul.f32 0.2, %v226_v47  ;;  %v398_v56 = vmul.f32 0.2, %v290_v48  ;;  %577 = vst.msk [vmem:[%s1035_s3 + $0xc] sm:$0xf] %vm573_vm2, %v678_v50 }
  0xe5   :  { %v432_v57 = vsel %vm368_vm8, %v298_v44, %v400_v51  ;;  %vm355_vm11 = vcmp.ge.f32.partialorder %v247_v52, 0.0  ;;  %v387_v58 = vmul.f32 0.2, %v247_v52  ;;  %v302_v60 = vpop.f32.mrb[5].mxu1  ;;  %v733_v61 = vpop.f32.mrb[6].mxu0  ;;  %vm371_vm12 = vcmp.ge.f32.partialorder %v311_v59, 0.0 }
  0xe6   :  { %v694_v62 = vpack.c.bf16 %v432_v57, %v432_v57  ;;  %v414_v63 = vsel %vm350_vm9, %v226_v47, %v382_v55  ;;  %v430_v0 = vsel %vm366_vm10, %v290_v48, %v398_v56  ;;  %v749_v2 = vpop.f32.mrb[6].mxu1  ;;  %v241_v3 = vpop.f32.mrb[7].mxu0  ;;  %v403_v9 = vmul.f32 0.2, %v311_v59 }
  0xe7   :  { %v676_v4 = vpack.c.bf16 %v414_v63, %v414_v63  ;;  %v692_v5 = vpack.c.bf16 %v430_v0, %v430_v0  ;;  %v419_v6 = vsel %vm355_vm11, %v247_v52, %v387_v58  ;;  %v305_v7 = vpop.f32.mrb[7].mxu1  ;;  %vm353_vm13 = vcmp.ge.f32.partialorder %v239_v1, 0.0 }
  0xe8   :  { %593 = vst.msk [vmem:[%s1035_s3 + $0x4c] sm:$0xf] %vm573_vm2, %v694_v62  ;;  %v681_v8 = vpack.c.bf16 %v419_v6, %v419_v6  ;;  %v385_v10 = vmul.f32 0.2, %v239_v1  ;;  %v303_v11 = vadd.f32 %v868_v18, %v302_v60  ;;  %v250_v12 = vadd.f32 %v733_v61, %v868_v18 }
  0xe9   :  { %575 = vst.msk [vmem:[%s1035_s3 + $0x4] sm:$0xf] %vm573_vm2, %v676_v4  ;;  %591 = vst.msk [vmem:[%s1035_s3 + $0x44] sm:$0xf] %vm573_vm2, %v692_v5  ;;  %v314_v13 = vadd.f32 %v749_v2, %v868_v18  ;;  %v242_v14 = vadd.f32 %v868_v18, %v241_v3  ;;  %v435_v15 = vsel %vm371_vm12, %v311_v59, %v403_v9  ;;  %v736_v19 = vpop.f32.mrb[8].mxu0  ;;  %v752_v23 = vpop.f32.mrb[8].mxu1 }
  0xea   :  { %580 = vst.msk [vmem:[%s1035_s3 + $0x18] sm:$0xf] %vm573_vm2, %v681_v8  ;;  %v417_v16 = vsel %vm353_vm13, %v239_v1, %v385_v10  ;;  %v306_v17 = vadd.f32 %v868_v18, %v305_v7  ;;  %v697_v20 = vpack.c.bf16 %v435_v15, %v435_v15  ;;  %vm369_vm14 = vcmp.ge.f32.partialorder %v303_v11, 0.0  ;;  %v254_v24 = vpop.f32.mrb[9].mxu0  ;;  %v318_v29 = vpop.f32.mrb[9].mxu1 }
  0xeb   :  { %v679_v21 = vpack.c.bf16 %v417_v16, %v417_v16  ;;  %v401_v22 = vmul.f32 0.2, %v303_v11  ;;  %vm356_vm15 = vcmp.ge.f32.partialorder %v250_v12, 0.0  ;;  %v388_v25 = vmul.f32 0.2, %v250_v12  ;;  %v737_v30 = vpop.f32.mrb[10].mxu0 }
  0xec   :  { %vm372_vm0 = vcmp.ge.f32.partialorder %v314_v13, 0.0  ;;  %v404_v26 = vmul.f32 0.2, %v314_v13  ;;  %596 = vst.msk [vmem:[%s1035_s3 + $0x58] sm:$0xf] %vm573_vm2, %v697_v20  ;;  %vm354_vm1 = vcmp.ge.f32.partialorder %v242_v14, 0.0  ;;  %v263_v40 = vadd.f32 %v736_v19, %v868_v18 }
  0xed   :  { %578 = vst.msk [vmem:[%s1035_s3 + $0x10] sm:$0xf] %vm573_vm2, %v679_v21  ;;  %v433_v27 = vsel %vm369_vm14, %v303_v11, %v401_v22  ;;  %v386_v28 = vmul.f32 0.2, %v242_v14  ;;  %vm370_vm3 = vcmp.ge.f32.partialorder %v306_v17, 0.0  ;;  %v420_v32 = vsel %vm356_vm15, %v250_v12, %v388_v25  ;;  %v753_v35 = vpop.f32.mrb[10].mxu1 }
  0xee   :  { %v695_v31 = vpack.c.bf16 %v433_v27, %v433_v27  ;;  %v436_v33 = vsel %vm372_vm0, %v314_v13, %v404_v26  ;;  %v402_v34 = vmul.f32 0.2, %v306_v17  ;;  %v257_v36 = vpop.f32.mrb[11].mxu0  ;;  %v682_v37 = vpack.c.bf16 %v420_v32, %v420_v32  ;;  %v321_v41 = vpop.f32.mrb[11].mxu1 }
  0xef   :  { %v698_v38 = vpack.c.bf16 %v436_v33, %v436_v33  ;;  %v418_v39 = vsel %vm354_vm1, %v242_v14, %v386_v28  ;;  %v327_v44 = vadd.f32 %v752_v23, %v868_v18  ;;  %v255_v45 = vadd.f32 %v868_v18, %v254_v24 }
  0xf0   :  { %594 = vst.msk [vmem:[%s1035_s3 + $0x50] sm:$0xf] %vm573_vm2, %v695_v31  ;;  %v680_v42 = vpack.c.bf16 %v418_v39, %v418_v39  ;;  %v434_v43 = vsel %vm370_vm3, %v306_v17, %v402_v34  ;;  %581 = vst.msk [vmem:[%s1035_s3 + $0x1c] sm:$0xf] %vm573_vm2, %v682_v37  ;;  %vm359_vm4 = vcmp.ge.f32.partialorder %v263_v40, 0.0  ;;  %v319_v48 = vadd.f32 %v868_v18, %v318_v29 }
  0xf1   :  { %597 = vst.msk [vmem:[%s1035_s3 + $0x5c] sm:$0xf] %vm573_vm2, %v698_v38  ;;  %v696_v46 = vpack.c.bf16 %v434_v43, %v434_v43  ;;  %v391_v47 = vmul.f32 0.2, %v263_v40  ;;  %vm375_vm5 = vcmp.ge.f32.partialorder %v327_v44, 0.0  ;;  %vm357_vm6 = vcmp.ge.f32.partialorder %v255_v45, 0.0 }
  0xf2   :  { %579 = vst.msk [vmem:[%s1035_s3 + $0x14] sm:$0xf] %vm573_vm2, %v680_v42  ;;  %v407_v49 = vmul.f32 0.2, %v327_v44  ;;  %v389_v50 = vmul.f32 0.2, %v255_v45  ;;  %v266_v53 = vadd.f32 %v737_v30, %v868_v18  ;;  %v330_v59 = vadd.f32 %v753_v35, %v868_v18 }
  0xf3   :  { %595 = vst.msk [vmem:[%s1035_s3 + $0x54] sm:$0xf] %vm573_vm2, %v696_v46  ;;  %v423_v51 = vsel %vm359_vm4, %v263_v40, %v391_v47  ;;  %vm373_vm7 = vcmp.ge.f32.partialorder %v319_v48, 0.0  ;;  %v405_v52 = vmul.f32 0.2, %v319_v48  ;;  %v740_v54 = vpop.f32.mrb[12].mxu0  ;;  %v258_v7 = vadd.f32 %v868_v18, %v257_v36 }
  0xf4   :  { %v756_v55 = vpop.f32.mrb[12].mxu1  ;;  %v685_v56 = vpack.c.bf16 %v423_v51, %v423_v51  ;;  %v439_v57 = vsel %vm375_vm5, %v327_v44, %v407_v49  ;;  %v421_v58 = vsel %vm357_vm6, %v255_v45, %v389_v50  ;;  %v270_v60 = vpop.f32.mrb[13].mxu0  ;;  %vm360_vm8 = vcmp.ge.f32.partialorder %v266_v53, 0.0 }
  0xf5   :  { %v334_v61 = vpop.f32.mrb[13].mxu1  ;;  %v701_v62 = vpack.c.bf16 %v439_v57, %v439_v57  ;;  %v683_v63 = vpack.c.bf16 %v421_v58, %v421_v58  ;;  %v437_v0 = vsel %vm373_vm7, %v319_v48, %v405_v52  ;;  %v741_v1 = vpop.f32.mrb[14].mxu0  ;;  %v392_v4 = vmul.f32 0.2, %v266_v53 }
  0xf6   :  { %v757_v2 = vpop.f32.mrb[14].mxu1  ;;  %584 = vst.msk [vmem:[%s1035_s3 + $0x28] sm:$0xf] %vm573_vm2, %v685_v56  ;;  %v699_v3 = vpack.c.bf16 %v437_v0, %v437_v0  ;;  %vm376_vm9 = vcmp.ge.f32.partialorder %v330_v59, 0.0  ;;  %v408_v5 = vmul.f32 0.2, %v330_v59  ;;  %v322_v8 = vadd.f32 %v868_v18, %v321_v41 }
  0xf7   :  { %v273_v6 = vpop.f32.mrb[15].mxu0  ;;  %600 = vst.msk [vmem:[%s1035_s3 + $0x68] sm:$0xf] %vm573_vm2, %v701_v62  ;;  %582 = vst.msk [vmem:[%s1035_s3 + $0x20] sm:$0xf] %vm573_vm2, %v683_v63  ;;  %v279_v9 = vadd.f32 %v740_v54, %v868_v18  ;;  %v343_v10 = vadd.f32 %v756_v55, %v868_v18  ;;  %v337_v11 = vpop.f32.mrb[15].mxu1  ;;  %v424_v12 = vsel %vm360_vm8, %v266_v53, %v392_v4 }
  0xf8   :  { %598 = vst.msk [vmem:[%s1035_s3 + $0x60] sm:$0xf] %vm573_vm2, %v699_v3  ;;  %v440_v13 = vsel %vm376_vm9, %v330_v59, %v408_v5  ;;  %v271_v14 = vadd.f32 %v868_v18, %v270_v60  ;;  %v335_v15 = vadd.f32 %v868_v18, %v334_v61  ;;  %v686_v16 = vpack.c.bf16 %v424_v12, %v424_v12 }
  0xf9   :  { %v702_v17 = vpack.c.bf16 %v440_v13, %v440_v13  ;;  %vm358_vm10 = vcmp.ge.f32.partialorder %v258_v7, 0.0  ;;  %v390_v19 = vmul.f32 0.2, %v258_v7  ;;  %vm374_vm11 = vcmp.ge.f32.partialorder %v322_v8, 0.0 }
  0xfa   :  { %v406_v20 = vmul.f32 0.2, %v322_v8  ;;  %vm363_vm12 = vcmp.ge.f32.partialorder %v279_v9, 0.0  ;;  %v395_v21 = vmul.f32 0.2, %v279_v9  ;;  %vm379_vm13 = vcmp.ge.f32.partialorder %v343_v10, 0.0 }
  0xfb   :  { %585 = vst.msk [vmem:[%s1035_s3 + $0x2c] sm:$0xf] %vm573_vm2, %v686_v16  ;;  %601 = vst.msk [vmem:[%s1035_s3 + $0x6c] sm:$0xf] %vm573_vm2, %v702_v17  ;;  %v422_v22 = vsel %vm358_vm10, %v258_v7, %v390_v19  ;;  %v411_v23 = vmul.f32 0.2, %v343_v10  ;;  %v282_v34 = vadd.f32 %v741_v1, %v868_v18  ;;  %v346_v36 = vadd.f32 %v757_v2, %v868_v18 }
  0xfc   :  { %vm361_vm14 = vcmp.ge.f32.partialorder %v271_v14, 0.0  ;;  %v684_v24 = vpack.c.bf16 %v422_v22, %v422_v22  ;;  %v438_v25 = vsel %vm374_vm11, %v322_v8, %v406_v20  ;;  %v427_v26 = vsel %vm363_vm12, %v279_v9, %v395_v21 }
  0xfd   :  { %v393_v27 = vmul.f32 0.2, %v271_v14  ;;  %v700_v28 = vpack.c.bf16 %v438_v25, %v438_v25  ;;  %v689_v29 = vpack.c.bf16 %v427_v26, %v427_v26  ;;  %v443_v30 = vsel %vm379_vm13, %v343_v10, %v411_v23 }
  0xfe   :  { %vm377_vm15 = vcmp.ge.f32.partialorder %v335_v15, 0.0  ;;  %583 = vst.msk [vmem:[%s1035_s3 + $0x24] sm:$0xf] %vm573_vm2, %v684_v24  ;;  %v705_v31 = vpack.c.bf16 %v443_v30, %v443_v30  ;;  %v409_v33 = vmul.f32 0.2, %v335_v15  ;;  %v274_v37 = vadd.f32 %v868_v18, %v273_v6 }
  0xff   :  { %v425_v32 = vsel %vm361_vm14, %v271_v14, %v393_v27  ;;  %599 = vst.msk [vmem:[%s1035_s3 + $0x64] sm:$0xf] %vm573_vm2, %v700_v28  ;;  %588 = vst.msk [vmem:[%s1035_s3 + $0x38] sm:$0xf] %vm573_vm2, %v689_v29  ;;  %v338_v38 = vadd.f32 %v868_v18, %v337_v11  ;;  %vm364_vm0 = vcmp.ge.f32.partialorder %v282_v34, 0.0  ;;  %vm380_vm1 = vcmp.ge.f32.partialorder %v346_v36, 0.0 }
 0x100   :  { %v687_v35 = vpack.c.bf16 %v425_v32, %v425_v32  ;;  %604 = vst.msk [vmem:[%s1035_s3 + $0x78] sm:$0xf] %vm573_vm2, %v705_v31  ;;  %v441_v39 = vsel %vm377_vm15, %v335_v15, %v409_v33  ;;  %v396_v40 = vmul.f32 0.2, %v282_v34  ;;  %v412_v42 = vmul.f32 0.2, %v346_v36 }
 0x101   :  { %v703_v41 = vpack.c.bf16 %v441_v39, %v441_v39  ;;  %vm362_vm3 = vcmp.ge.f32.partialorder %v274_v37, 0.0  ;;  %v394_v44 = vmul.f32 0.2, %v274_v37  ;;  %vm378_vm4 = vcmp.ge.f32.partialorder %v338_v38, 0.0 }
 0x102   :  { %586 = vst.msk [vmem:[%s1035_s3 + $0x30] sm:$0xf] %vm573_vm2, %v687_v35  ;;  %v428_v43 = vsel %vm364_vm0, %v282_v34, %v396_v40  ;;  %v410_v18 = vmul.f32 0.2, %v338_v38  ;;  %v444_v46 = vsel %vm380_vm1, %v346_v36, %v412_v42 }
 0x103   :  { %602 = vst.msk [vmem:[%s1035_s3 + $0x70] sm:$0xf] %vm573_vm2, %v703_v41  ;;  %v690_v45 = vpack.c.bf16 %v428_v43, %v428_v43  ;;  %v706_v47 = vpack.c.bf16 %v444_v46, %v444_v46  ;;  %v426_v48 = vsel %vm362_vm3, %v274_v37, %v394_v44 }
 0x104   :  { %v442_v49 = vsel %vm378_vm4, %v338_v38, %v410_v18  ;;  %v688_v50 = vpack.c.bf16 %v426_v48, %v426_v48 }
 0x105   :  { %589 = vst.msk [vmem:[%s1035_s3 + $0x3c] sm:$0xf] %vm573_vm2, %v690_v45  ;;  %v704_v51 = vpack.c.bf16 %v442_v49, %v442_v49  ;;  %605 = vst.msk [vmem:[%s1035_s3 + $0x7c] sm:$0xf] %vm573_vm2, %v706_v47 }
 0x106   :  { %587 = vst.msk [vmem:[%s1035_s3 + $0x34] sm:$0xf] %vm573_vm2, %v688_v50 }
 0x107   :  { %603 = vst.msk [vmem:[%s1035_s3 + $0x74] sm:$0xf] %vm573_vm2, %v704_v51 }

</bundles_post_ra>
